<compile_context>
chip_gen: v6e
topology: v6e:2x2x1
jax: 0.10.0
libtpu: 0.0.40
codegen_flags: <defaults>
</compile_context>

<pallas_src>
import jax
import jax.numpy as jnp
from jax import lax
from jax.experimental import pallas as pl
from jax.experimental.pallas import tpu as pltpu


# ----------------------------- Pallas kernels --------------------------------


def _conv1_cat_kernel(p_ref, w_ref, b_ref, out_ref):
    """x1 = W @ P + b ; out = concat([x1, relu(x1)], channel).

    p_ref  : (9*Cin, H*W)   im2col patches of the input (lane axis = H*W)
    w_ref  : (F, 9*Cin)     conv1 weights, (kh,kw)-major / channel-minor rows
    b_ref  : (F, 1)
    out_ref: (2*F, H*W)
    """
    x1 = jnp.dot(w_ref[...], p_ref[...], preferred_element_type=jnp.float32)
    x1 = x1 + b_ref[...]
    out_ref[...] = jnp.concatenate(
        [x1, jnp.maximum(x1, 0.0)], axis=0).astype(out_ref.dtype)


def _conv2_relu_kernel(p_ref, w_ref, b_ref, out_ref):
    """out = relu(W @ P + b).

    p_ref  : (9*2F, H*W)
    w_ref  : (3F, 9*2F)
    b_ref  : (3F, 1)
    out_ref: (3F, H*W)
    """
    y = jnp.dot(w_ref[...], p_ref[...], preferred_element_type=jnp.float32)
    out_ref[...] = jnp.maximum(y + b_ref[...], 0.0).astype(out_ref.dtype)


# ------------------------------ wrapper glue ----------------------------------


def _im2col_nchw(x):
    """(N, C, H, W) -> (N, 9*C, H*W); rows ordered (kh, kw)-major, channel-minor."""
    N, C, H, W = x.shape
    xp = jnp.pad(x, ((0, 0), (0, 0), (1, 1), (1, 1)))
    taps = [xp[:, :, kh:kh + H, kw:kw + W] for kh in range(3) for kw in range(3)]
    return jnp.stack(taps, axis=1).reshape(N, 9 * C, H * W)


def _reshape_weight(w_oihw):
    """(Cout, Cin, 3, 3) -> (Cout, 9*Cin), matching _im2col_nchw row order."""
    Cout, Cin = w_oihw.shape[:2]
    return jnp.transpose(w_oihw, (0, 2, 3, 1)).reshape(Cout, 9 * Cin)


def _conv_pallas(kernel_fn, patches, w_r, b_col, out_channels):
    """One lane-dense (Cout, 9*Cin) x (9*Cin, H*W) conv kernel, grid over batch."""
    N, K, HW = patches.shape
    return pl.pallas_call(
        kernel_fn,
        out_shape=jax.ShapeDtypeStruct((N, out_channels, HW), patches.dtype),
        grid=(N,),
        in_specs=[
            pl.BlockSpec((None, K, HW), lambda n: (n, 0, 0)),
            pl.BlockSpec(w_r.shape, lambda n: (0, 0)),
            pl.BlockSpec(b_col.shape, lambda n: (0, 0)),
        ],
        out_specs=pl.BlockSpec((None, out_channels, HW), lambda n: (n, 0, 0)),
        compiler_params=pltpu.CompilerParams(
            dimension_semantics=("parallel",)),
    )(patches, w_r, b_col)


def denseblock_forward(x, w1, b1, w2, b2):
    """Denseblock forward.  x: (N, Cin, H, W) -> (N, 4*F, H, W), NCHW throughout."""
    N, Cin, H, W = x.shape
    F = w1.shape[0]

    w1r = _reshape_weight(w1)        # (F, 9*Cin)
    w2r = _reshape_weight(w2)        # (3F, 9*2F)
    b1c = b1.reshape(F, 1)
    b2c = b2.reshape(3 * F, 1)

    # ---- layer 1: x1 = conv1(x); x2cat = cat([x1, relu(x1)]) ----------------
    p1 = _im2col_nchw(x)                                          # (N, 9*Cin, HW)
    x12 = _conv_pallas(_conv1_cat_kernel, p1, w1r, b1c, 2 * F)    # (N, 2F, HW)

    # ---- layer 2: x3 = relu(conv2(x2cat)) -----------------------------------
    p2 = _im2col_nchw(x12.reshape(N, 2 * F, H, W))                # (N, 18F, HW)
    x3 = _conv_pallas(_conv2_relu_kernel, p2, w2r, b2c, 3 * F)    # (N, 3F, HW)

    # ---- output: cat([x1, x3], channel) — cheap major-dim concat in XLA -----
    x1 = x12[:, :F, :]
    out = jnp.concatenate([x1, x3], axis=1)
    return out.reshape(N, 4 * F, H, W)


# ------------------------------ reference -------------------------------------


def _reference(x, w1, b1, w2, b2):
    """Pure-JAX reference mirroring the PyTorch forward."""
    def conv(t, w, b):
        y = lax.conv_general_dilated(
            t, w, window_strides=(1, 1), padding=((1, 1), (1, 1)),
            dimension_numbers=("NCHW", "OIHW", "NCHW"))
        return y + b[None, :, None, None]

    x1 = conv(x, w1, b1)
    x2c = jnp.concatenate([x1, jnp.maximum(x1, 0.0)], axis=1)
    x3 = jnp.maximum(conv(x2c, w2, b2), 0.0)
    return jnp.concatenate([x1, x3], axis=1)


if __name__ == "__main__":
    # Shapes implied by Denseblock(conv, input_channel=4, n_feats=4, kernel_size=3)
    N, Cin, H, W = 2, 4, 16, 16
    F = 4

    key = jax.random.PRNGKey(0)
    kx, kw1, kb1, kw2, kb2 = jax.random.split(key, 5)

    x = jax.random.normal(kx, (N, Cin, H, W), dtype=jnp.float32)

    def conv_init(kw, kb, cout, cin):
        fan_in = cin * 3 * 3
        bound = 1.0 / (fan_in ** 0.5)
        w = jax.random.uniform(kw, (cout, cin, 3, 3), jnp.float32, -bound, bound)
        b = jax.random.uniform(kb, (cout,), jnp.float32, -bound, bound)
        return w, b

    w1, b1 = conv_init(kw1, kb1, F, Cin)          # dn_layer1: Cin -> F
    w2, b2 = conv_init(kw2, kb2, 3 * F, 2 * F)    # dn_layer2: 2F  -> 3F

    out = jax.block_until_ready(denseblock_forward(x, w1, b1, w2, b2))
    ref = jax.block_until_ready(_reference(x, w1, b1, w2, b2))

    assert out.shape == (N, 4 * F, H, W), out.shape
    err = float(jnp.max(jnp.abs(out - ref)))
    assert jnp.allclose(out, ref, atol=1e-4, rtol=1e-4), f"mismatch vs reference, max abs err={err}"
    print("KERNEL_OK")
</pallas_src>

<mosaic_0001>
module attributes {stable_mosaic.version = 11 : i64} {
  func.func @_conv1_cat_kernel(%arg0: i32, %arg1: memref<1x36x256xf32, #tpu.memory_space<vmem>>, %arg2: memref<4x36xf32, #tpu.memory_space<vmem>>, %arg3: memref<4x1xf32, #tpu.memory_space<vmem>>, %arg4: memref<1x8x256xf32, #tpu.memory_space<vmem>>) attributes {dimension_semantics = [#tpu.dimension_semantics<parallel>], iteration_bounds = array<i64: 2>, scalar_prefetch = 0 : i64, scratch_operands = 0 : i64, tpu.core_type = #tpu.core_type<tc>, window_params = [{transform_indices = @transform_0, window_bounds = array<i64: 1, 36, 256>}, {pipeline_mode = #tpu.pipeline_mode<synchronous>, transform_indices = @transform_1, window_bounds = array<i64: 4, 36>}, {pipeline_mode = #tpu.pipeline_mode<synchronous>, transform_indices = @transform_2, window_bounds = array<i64: 4, 1>}, {transform_indices = @transform_3, window_bounds = array<i64: 1, 8, 256>}]} {
    %c0 = arith.constant 0 : index
    %c0_0 = arith.constant 0 : index
    %0 = vector.load %arg2[%c0, %c0_0] : memref<4x36xf32, #tpu.memory_space<vmem>>, vector<4x36xf32>
    %c0_1 = arith.constant 0 : index
    %c0_2 = arith.constant 0 : index
    %c0_3 = arith.constant 0 : index
    %1 = vector.load %arg1[%c0_1, %c0_2, %c0_3] : memref<1x36x256xf32, #tpu.memory_space<vmem>>, vector<1x36x256xf32>
    %2 = vector.shape_cast %1 : vector<1x36x256xf32> to vector<36x256xf32>
    %cst = arith.constant dense<0.000000e+00> : vector<4x256xf32>
    %3 = tpu.matmul %0, %2, %cst {dimension_numbers = #tpu.dot_dimension_numbers<[1], [0], [0], [1], [0, 0, 1, 1], [], []>} : vector<4x36xf32>, vector<36x256xf32>, vector<4x256xf32> -> vector<4x256xf32>
    %c0_4 = arith.constant 0 : index
    %c0_5 = arith.constant 0 : index
    %4 = vector.load %arg3[%c0_4, %c0_5] : memref<4x1xf32, #tpu.memory_space<vmem>>, vector<4x1xf32>
    %5 = vector.broadcast %4 : vector<4x1xf32> to vector<4x256xf32>
    %6 = arith.addf %3, %5 : vector<4x256xf32>
    %cst_6 = arith.constant 0.000000e+00 : f32
    %7 = vector.broadcast %cst_6 : f32 to vector<4x256xf32>
    %8 = arith.maximumf %6, %7 : vector<4x256xf32>
    %9 = tpu.concatenate %6, %8 in 0 : vector<4x256xf32>, vector<4x256xf32> -> vector<8x256xf32>
    %c0_7 = arith.constant 0 : index
    %c0_8 = arith.constant 0 : index
    %c0_9 = arith.constant 0 : index
    %10 = vector.load %arg4[%c0_7, %c0_8, %c0_9] : memref<1x8x256xf32, #tpu.memory_space<vmem>>, vector<1x8x256xf32>
    %11 = vector.shape_cast %10 : vector<1x8x256xf32> to vector<8x256xf32>
    %12 = vector.shape_cast %9 : vector<8x256xf32> to vector<1x8x256xf32>
    tpu.vector_store %arg4[%c0_7, %c0_8, %c0_9], %12 {strides = array<i32>} : memref<1x8x256xf32, #tpu.memory_space<vmem>>, vector<1x8x256xf32>,
    return
  }
  func.func @transform_0(%arg0: i32) -> (i32, i32, i32) {
    %c0_i32 = arith.constant 0 : i32
    %c0_i32_0 = arith.constant 0 : i32
    %c0_i32_1 = arith.constant 0 : i32
    return %arg0, %c0_i32, %c0_i32_0 : i32, i32, i32
  }
  func.func @transform_1(%arg0: i32) -> (i32, i32) {
    %c0_i32 = arith.constant 0 : i32
    %c0_i32_0 = arith.constant 0 : i32
    %c0_i32_1 = arith.constant 0 : i32
    return %c0_i32, %c0_i32_0 : i32, i32
  }
  func.func @transform_2(%arg0: i32) -> (i32, i32) {
    %c0_i32 = arith.constant 0 : i32
    %c0_i32_0 = arith.constant 0 : i32
    %c0_i32_1 = arith.constant 0 : i32
    return %c0_i32, %c0_i32_0 : i32, i32
  }
  func.func @transform_3(%arg0: i32) -> (i32, i32, i32) {
    %c0_i32 = arith.constant 0 : i32
    %c0_i32_0 = arith.constant 0 : i32
    %c0_i32_1 = arith.constant 0 : i32
    return %arg0, %c0_i32, %c0_i32_0 : i32, i32, i32
  }
}

</mosaic_0001>

<bundles_post_ra>
// kernel: tpu_custom_call.1
= control target key start
LH: loop header
LB: loop body
LE: loop exit
PB: predicated region body
PF: predicated region fallthrough
CT: control target
= control target key end

     0   :  { %8 = vsyncpa [#allocation3], 0  ;;  %s600_s0 = inlined_call_operand.vmem [shape: f32[2,36,256], index: 0, kind: input, shape index: {}]   ;;  %s601_s1 = inlined_call_operand.vmem [shape: f32[4,36], index: 1, kind: input, shape index: {}]   ;;  %s602_s2 = inlined_call_operand.vmem [shape: f32[4,1], index: 2, kind: input, shape index: {}]   ;;  %s603_s3 = inlined_call_operand.hbm [shape: f32[2,8,256], index: 3, kind: output, shape index: {}]  }
   0x1   :  { %10 = vsyncpa [#allocation3 + $0x1], 0  ;;  %s497_s12 = smov 0   ;;  %s499_s13 = smov 0  }
   0x2   :  { %s501_s14 = smov 0   ;;  %s503_s15 = smov 0  }
   0x3 LB: > { %s518_s16 = sadd.s32 4294967295, %s472_s15   ;;  %s354_s17 = sadd.s32 4294967294, %s472_s15   ;;  %s472_s15 = sphi %s503_s15, %s609_s15   ;;  %s468_s14 = sphi %s501_s14, %s608_s14   ;;  %s464_s13 = sphi %s499_s13, %s607_s13   ;;  %s460_s12 = sphi %s497_s12, %s606_s12  }
   0x4   : > { %s522_s18 = sadd.s32 1, %s472_s15   ;;  %s91_s19 = sadd.s32 1, %s468_s14 }
   0x5   : > { %s88_s20 = ssub.s32 %s472_s15, %s522_s18  ;;  %p101_p0 = scmp.ne.s32.totalorder %s468_s14, %s464_s13 }
   0x6   : > { %p89_p1 = scmp.eq.s32.totalorder %s88_s20, 0  ;;  %p102_p2 = scmp.eq.s32.totalorder %s518_s16, 1 }
   0x7   : > { %p107_p3 = scmp.ne.s32.totalorder %s464_s13, %s460_s12  ;;  %p108_p4 = scmp.eq.s32.totalorder %s354_s17, 1 }
   0x8   : > { %s533_s21 = scalar_select %p89_p1, %s468_s14, %s91_s19  }
   0x9   : > { %p535_p5 = por %p102_p2, %p101_p0  ;;  %p539_p6 = por %p108_p4, %p107_p3 }
   0xa   : > { %p357_p7 = scmp.ge.s32.totalorder %s472_s15, 1  ;;  %p140_p8 = scmp.lt.s32.totalorder %s472_s15, 3 }
   0xc   : > { %p141_p9 = pnand %p357_p7, %p140_p8 }
   0xd   : > { %p164_p10 = scmp.lt.s32.totalorder (!%p141_p9), %s518_s16, 1  ;;  %s161_s6 = sand.u32 (!%p141_p9), 1, %s464_s13  }
   0xe   : > { %144 = sbr.rel (%p141_p9) target bundleno = 250 (0xfa), region = 32  ;;  %s358_s7 = sshll.u32 (!%p141_p9), %s161_s6, 4 }
   0xf   : > { %s368_s8 = sshll.u32 (!%p141_p9), %s518_s16, 8  ;;  %s163_s9 = scalar_lea.vmem (!%p141_p9), [#allocation2], %s358_s7 }
  0x10   : > { %s295_s10 = sshll.u32 (!%p141_p9), %s163_s9, 4  ;;  %s564_s19 = scalar_lea.hbm (!%p141_p9), %s603_s3, %s368_s8  ;;  %s296_s10 = int_to_ptr.vmem [resolvable:$true] %s295_s10 }
  0x11   : > { %s281_s20 = scalar_lea.sflag (!%p141_p9), [#allocation3], %s161_s6  ;;  %s412_s24 = scalar_lea.vmem (!%p141_p9), %s296_s10, 256 }
  0x12   : > { %p413_p11 = scmp.ne.s32.totalorder (!%p141_p9), %s296_s10, %s412_s24 }
  0x13   : > { %v474_v0 = vmov 0.0   ;;  %v180_v1 = vld [vmem:[%s602_s2] sm:$0xf]  ;;  %s165_s26 = scalar_select %p164_p10, %s518_s16, 1  ;;  %v475_v2 = vmov 0   ;;  %vm190_vm0 = vcmask 1043456  }
  0x14   : > { %261 = vmatprep.mubr.f32.mxu0 %v474_v0  ;;  %411 = vset.pattern.permute.xlu0 %v475_v2  ;;  %v169_v13 = vld [vmem:[%s601_s1] sm:$0xf]  ;;  %vm186_vm1 = vcmask 293888   ;;  %p414_p12 = pnand %p413_p11, %p535_p5  ;;  %s476_s16 = smov [#allocation2]  }
  0x15   : > { %183 = vperm.xlu0 %411, %v180_v1   ;;  %s369_s27 = smul.u32 80, %s165_s26  ;;  %s416_s25 = sshll.u32 %s476_s16, 4  ;;  %s417_s25 = int_to_ptr.vmem [resolvable:$false] %s416_s25 }
  0x16   : > { %p415_p13 = pneg %p414_p12  ;;  %s418_s26 = scalar_lea.vmem %s417_s25, 512 }
  0x17   : > { %s168_s30 = scalar_lea.vmem %s600_s0, %s369_s27  ;;  %p419_p0 = scmp.lt.s32.totalorder %s296_s10, %s417_s25 }
  0x18   : > { %v179_v3 = vld [vmem:[%s168_s30 + $0x48] sm:$0xf]  ;;  %v178_v4 = vld [vmem:[%s168_s30 + $0x40] sm:$0xf]  ;;  %v177_v5 = vld [vmem:[%s168_s30 + $0x38] sm:$0xff]  ;;  %p420_p1 = scmp.lt.s32.totalorder %s418_s26, %s412_s24 }
  0x19   : > { %360 = vmatprep.subr.msk.mxu0 %vm190_vm0, %v179_v3  ;;  %v176_v6 = vld [vmem:[%s168_s30 + $0x30] sm:$0xff]  ;;  %v175_v7 = vld [vmem:[%s168_s30 + $0x28] sm:$0xff]  ;;  %v174_v8 = vld [vmem:[%s168_s30 + $0x20] sm:$0xff] }
  0x1a   : > { %361 = vmatpush1.msk.msra.mxu0 %vm190_vm0, %v178_v4  ;;  %v173_v9 = vld [vmem:[%s168_s30 + $0x18] sm:$0xff]  ;;  %v172_v10 = vld [vmem:[%s168_s30 + $0x10] sm:$0xff]  ;;  %v171_v11 = vld [vmem:[%s168_s30 + $0x8] sm:$0xff]  ;;  %p421_p2 = por %p420_p1, %p419_p0 }
  0x1b   : > { %221 = vmatprep.subr.mxu0 %v177_v5  ;;  %v170_v12 = vld [vmem:[%s168_s30] sm:$0xff] }
  0x1c   : > { %222 = vmatpush1.msra.mxu0 %v176_v6  ;;  %p422_p3 = pnand %p421_p2, %p415_p13 }
  0x1d   : > { %223 = vmatprep.subr.mxu0 %v175_v7 }
  0x1e   : > { %224 = vmatpush1.msra.mxu0 %v174_v8 }
  0x1f   : > { %225 = vmatprep.subr.mxu0 %v173_v9 }
  0x20   : > { %226 = vmatpush1.msra.mxu0 %v172_v10 }
  0x21   : > { %227 = vmatprep.subr.mxu0 %v171_v11 }
  0x22   : > { %228 = vmatpush1.msra.mxu0 %v170_v12 }
  0x23   : > { %362 = vmatmul.mubr.msk.f32.vlgmr.msra.gmra.mxu0 %vm186_vm1, %v169_v13 }
  0x90   : > { %v184_v14 = vpop.permute.xlu0 %183 }
  0xe3   : > { %v263_v15 = vpop.f32.mrf.mxu0 }
  0xe4   : > { %v264_v16 = vadd.f32 %v263_v15, %v184_v14 }
  0xe5   : > { %v265_v17 = vpop.f32.mrf.mxu0 }
  0xe6   : > { %v268_v18 = vmax.f32 %v264_v16, 0.0  ;;  %v266_v19 = vadd.f32 %v265_v17, %v184_v14 }
  0xe8   : > { %v272_v20 = vrot.slane %v268_v18, 4  ;;  %v269_v21 = vmax.f32 %v266_v19, 0.0 }
  0xea   : > { %v276_v22 = vsel %vm190_vm0, %v264_v16, %v272_v20  ;;  %v273_v23 = vrot.slane %v269_v21, 4 }
  0xeb   : > { %278 = vst [vmem:[%s163_s9] sm:$0xff] %v276_v22 }
  0xec   : > { %v277_v24 = vsel %vm190_vm0, %v266_v19, %v273_v23 }
  0xed   : > { %279 = vst [vmem:[%s163_s9 + $0x8] sm:$0xff] %v277_v24 }
  0xee   : > { %425 = shalt.err (!%p422_p3)
}
  0xef   : > { %s426_s27 = scalar_lea.hbm %s564_s19, 256  ;;  %s430_s30 = scalar_lea.hbm %s603_s3, 512 }
  0xf0   : > { %p427_p4 = scmp.ne.s32.totalorder %s564_s19, %s426_s27  ;;  %p431_p9 = scmp.lt.s32.totalorder %s564_s19, %s603_s3 }
  0xf1   : > { %p432_p10 = scmp.lt.s32.totalorder %s430_s30, %s426_s27 }
  0xf2   : > { %p428_p7 = pnand %p427_p4, %p535_p5 }
  0xf3   : > { %p433_p11 = por %p432_p10, %p431_p9 }
  0xf4   : > { %p429_p8 = pneg %p428_p7 }
  0xf6   : > { %p434_p12 = pnand %p433_p11, %p429_p8 }
  0xf8   : > { %437 = shalt.err (!%p434_p12)
}
  0xf9   : > { %370 = dma.vmem_to_hbm [thread:$0]  (%p535_p5), %s296_s10, 256, %s564_s19, %s281_s20  }
  0xfa PF: > { %p376_p13 = scmp.ge.s32.totalorder %s472_s15, 2  ;;  %s307_s6 = sand.u32 1, %s460_s12  }
  0xfb   : > { %s308_s7 = scalar_lea.sflag [#allocation3], %s307_s6 }
  0xfc   : > { %p373_p0 = pnand %p376_p13, %p539_p6 }
  0xfe   : > { %p374_p1 = pneg %p373_p0 }
 0x100   : > { %455 = dma.done.wait (%p374_p1), %s308_s7, 256  }
 0x101   : > { %457 = vsyncadd (%p374_p1), %s308_s7, 4294967040  ;;  %p13_p2 = scmp.ge.s32.totalorder %s522_s18, 4   ;;  %s606_s12 = smov %s464_s13 }
 0x102   : > { %s607_s13 = smov %s468_s14  ;;  %s608_s14 = smov %s533_s21 }
 0x103   : > { %s609_s15 = smov %s522_s18  ;;  %15 = sbr.rel (!%p13_p2) target bundleno = 3 (0x3), region = 67 }
 0x108   :  { %313 = vsyncpa [#allocation3], 1 }
 0x109   :  { %315 = vsyncpa [#allocation3 + $0x1], 1 }

</bundles_post_ra>
